<compile_context>
chip_gen: v7x
topology: tpu7x:2x2x1
jax: 0.10.0
libtpu: 0.0.40
codegen_flags: <defaults>
</compile_context>

<pallas_src>
from functools import partial

import jax
import jax.numpy as jnp
from jax.experimental import pallas as pl
from jax.experimental.pallas import tpu as pltpu


# ----------------------------------------------------------------------------
# Kernel: LayerNorm over the channel (sublane) axis of a (Bblk, C, HWblk) tile.
# ----------------------------------------------------------------------------
def _layernorm_kernel(x_ref, w_ref, b_ref, o_ref, *, bias_free, eps):
    x = x_ref[...].astype(jnp.float32)          # (Bblk, C, HWblk)
    w = w_ref[...].astype(jnp.float32)          # (1, C, 1) -> broadcast
    # Single-pass moments over C (sublane reduce); eps guards tiny negative var.
    mu = jnp.mean(x, axis=1, keepdims=True)     # (Bblk, 1, HWblk)
    ex2 = jnp.mean(x * x, axis=1, keepdims=True)
    var = ex2 - mu * mu
    inv = jax.lax.rsqrt(var + eps)              # EUP rsqrt
    if bias_free:
        # PyTorch BiasFree_LayerNorm: x / sqrt(var + eps) * weight
        y = x * inv * w
    else:
        # PyTorch WithBias_LayerNorm: (x - mu) / sqrt(var + eps) * weight + bias
        y = (x - mu) * inv * w + b_ref[...].astype(jnp.float32)
    o_ref[...] = y.astype(o_ref.dtype)


# ----------------------------------------------------------------------------
# Tile-size heuristic: pack batches / tile HW (multiples of 128) so each input
# block is ~target_bytes, but keep >= 2 grid steps when possible (v7x megacore).
# The reduction is entirely over C inside a block, so B/HW tiling is always safe.
# ----------------------------------------------------------------------------
def _pick_block(B, C, HW, in_itemsize, target_bytes=2 << 20):
    # HW tile: largest multiple-of-128 divisor of HW whose per-batch-row tile
    # fits the target; full HW if HW isn't a multiple of 128.
    if HW % 128 == 0:
        divs = [d for d in range(128, HW + 1, 128) if HW % d == 0]
        fitting = [d for d in divs if C * d * in_itemsize <= target_bytes]
        hw_blk = max(fitting) if fitting else min(divs)
    else:
        hw_blk = HW

    # Batch packing: largest divisor of B keeping the block under target.
    per_b = C * hw_blk * in_itemsize
    b_blk = 1
    for d in range(1, B + 1):
        if B % d == 0 and d * per_b <= target_bytes:
            b_blk = d

    # Keep at least 2 parallel grid steps when the problem allows it (v7x has
    # 2 TensorCores; a single mega-step would serialize on one of them).
    if (B // b_blk) * (HW // hw_blk) < 2:
        if B > 1:
            for d in range(B // 2, 0, -1):
                if B % d == 0:
                    b_blk = d
                    break
        elif HW % 256 == 0 and hw_blk == HW:
            hw_blk = HW // 2
    return b_blk, hw_blk


def layernorm_pallas(x_nchw, weight, bias=None, *, bias_free=False, eps=1e-5):
    """LayerNorm module forward: NCHW in -> NCHW out, normalized over C."""
    if not bias_free and bias is None:
        raise ValueError("WithBias LayerNorm requires a bias parameter.")

    B, C, H, W = x_nchw.shape
    HW = H * W
    out_dtype = x_nchw.dtype

    # NCHW -> (B, C, HW) is a pure reshape (no transpose, no data movement);
    # the 'b c h w -> b (h w) c' rearrange is absorbed by reducing over the
    # sublane (C) axis of lane-dense (C, HW) tiles.
    x3 = x_nchw.reshape(B, C, HW)
    w3 = jnp.asarray(weight, jnp.float32).reshape(1, C, 1)
    if bias is None:
        bias = jnp.zeros((C,), jnp.float32)      # ignored by the BiasFree path
    b3 = jnp.asarray(bias, jnp.float32).reshape(1, C, 1)

    in_itemsize = x3.dtype.itemsize
    out_itemsize = jnp.dtype(out_dtype).itemsize
    b_blk, hw_blk = _pick_block(B, C, HW, in_itemsize)

    # Double-buffered in + out blocks + resident params, with headroom.
    blk_elems = b_blk * C * hw_blk
    vmem_needed = 2 * blk_elems * (in_itemsize + out_itemsize) + 4 * C * 4 * 2
    vmem_limit = int(min(48 << 20, max(16 << 20, vmem_needed + (1 << 20))))

    out = pl.pallas_call(
        partial(_layernorm_kernel, bias_free=bias_free, eps=eps),
        out_shape=jax.ShapeDtypeStruct((B, C, HW), out_dtype),
        grid=(B // b_blk, HW // hw_blk),
        in_specs=[
            pl.BlockSpec((b_blk, C, hw_blk), lambda b, s: (b, 0, s)),  # x
            pl.BlockSpec((1, C, 1), lambda b, s: (0, 0, 0)),           # weight (resident)
            pl.BlockSpec((1, C, 1), lambda b, s: (0, 0, 0)),           # bias   (resident)
        ],
        out_specs=pl.BlockSpec((b_blk, C, hw_blk), lambda b, s: (b, 0, s)),
        compiler_params=pltpu.CompilerParams(
            dimension_semantics=("parallel", "parallel"),  # no cross-step reduction
            vmem_limit_bytes=vmem_limit,
        ),
    )(x3, w3, b3)
    return out.reshape(B, C, H, W)


# ----------------------------------------------------------------------------
# Pure-JAX reference mirroring the PyTorch module (to_3d -> LN -> to_4d).
# ----------------------------------------------------------------------------
def layernorm_ref(x_nchw, weight, bias=None, *, bias_free=False, eps=1e-5):
    B, C, H, W = x_nchw.shape
    x3 = jnp.transpose(x_nchw, (0, 2, 3, 1)).reshape(B, H * W, C).astype(jnp.float32)
    mu = jnp.mean(x3, axis=-1, keepdims=True)
    var = jnp.mean((x3 - mu) ** 2, axis=-1, keepdims=True)
    if bias_free:
        y = x3 / jnp.sqrt(var + eps) * weight
    else:
        y = (x3 - mu) / jnp.sqrt(var + eps) * weight + bias
    y = y.astype(x_nchw.dtype)
    return jnp.transpose(y.reshape(B, H, W, C), (0, 3, 1, 2))


if __name__ == "__main__":
    B, C, H, W = 2, 16, 16, 16
    key = jax.random.PRNGKey(0)
    kx, kw, kb = jax.random.split(key, 3)
    x = jax.random.normal(kx, (B, C, H, W), jnp.float32)
    weight = 1.0 + 0.1 * jax.random.normal(kw, (C,), jnp.float32)
    bias = 0.1 * jax.random.normal(kb, (C,), jnp.float32)

    # WithBias variant (module default when LayerNorm_type != 'BiasFree').
    out_wb = jax.block_until_ready(layernorm_pallas(x, weight, bias, bias_free=False))
    ref_wb = layernorm_ref(x, weight, bias, bias_free=False)

    # BiasFree variant.
    out_bf = jax.block_until_ready(layernorm_pallas(x, weight, bias_free=True))
    ref_bf = layernorm_ref(x, weight, bias_free=True)

    assert out_wb.shape == (B, C, H, W) and out_wb.dtype == x.dtype
    if not bool(jnp.allclose(out_wb, ref_wb, rtol=1e-4, atol=1e-5)):
        raise AssertionError("WithBias LayerNorm Pallas output does not match reference")
    if not bool(jnp.allclose(out_bf, ref_bf, rtol=1e-4, atol=1e-5)):
        raise AssertionError("BiasFree LayerNorm Pallas output does not match reference")

    # bf16 smoke test: output dtype must follow input dtype (no f32 writeback).
    x_bf16 = x.astype(jnp.bfloat16)
    out_bf16 = jax.block_until_ready(
        layernorm_pallas(x_bf16, weight, bias, bias_free=False))
    ref_bf16 = layernorm_ref(x_bf16, weight, bias, bias_free=False)
    assert out_bf16.dtype == jnp.bfloat16
    if not bool(jnp.allclose(out_bf16.astype(jnp.float32),
                             ref_bf16.astype(jnp.float32),
                             rtol=3e-2, atol=3e-2)):
        raise AssertionError("bf16 LayerNorm Pallas output does not match reference")

    print("KERNEL_OK")
</pallas_src>

<mosaic_0001>
module attributes {stable_mosaic.version = 11 : i64} {
  func.func @_layernorm_kernel(%arg0: i32, %arg1: i32, %arg2: memref<1x16x256xf32, #tpu.memory_space<vmem>>, %arg3: memref<1x16x1xf32, #tpu.memory_space<vmem>>, %arg4: memref<1x16x1xf32, #tpu.memory_space<vmem>>, %arg5: memref<1x16x256xf32, #tpu.memory_space<vmem>>) attributes {dimension_semantics = [#tpu.dimension_semantics<parallel>, #tpu.dimension_semantics<parallel>], iteration_bounds = array<i64: 2, 1>, scalar_prefetch = 0 : i64, scratch_operands = 0 : i64, tpu.core_type = #tpu.core_type<tc>, window_params = [{transform_indices = @transform_0, window_bounds = array<i64: 1, 16, 256>}, {pipeline_mode = #tpu.pipeline_mode<synchronous>, transform_indices = @transform_1, window_bounds = array<i64: 1, 16, 1>}, {pipeline_mode = #tpu.pipeline_mode<synchronous>, transform_indices = @transform_2, window_bounds = array<i64: 1, 16, 1>}, {transform_indices = @transform_3, window_bounds = array<i64: 1, 16, 256>}]} {
    %c0 = arith.constant 0 : index
    %c0_0 = arith.constant 0 : index
    %c0_1 = arith.constant 0 : index
    %0 = vector.load %arg2[%c0, %c0_0, %c0_1] : memref<1x16x256xf32, #tpu.memory_space<vmem>>, vector<1x16x256xf32>
    %c0_2 = arith.constant 0 : index
    %c0_3 = arith.constant 0 : index
    %c0_4 = arith.constant 0 : index
    %1 = vector.load %arg3[%c0_2, %c0_3, %c0_4] : memref<1x16x1xf32, #tpu.memory_space<vmem>>, vector<1x16x1xf32>
    %cst = arith.constant dense<0.000000e+00> : vector<1x256xf32>
    %2 = vector.multi_reduction <add>, %0, %cst [1] : vector<1x16x256xf32> to vector<1x256xf32>
    %3 = vector.shape_cast %2 : vector<1x256xf32> to vector<1x1x256xf32>
    %cst_5 = arith.constant 1.600000e+01 : f32
    %4 = vector.broadcast %cst_5 : f32 to vector<1x1x256xf32>
    %5 = arith.divf %3, %4 : vector<1x1x256xf32>
    %6 = arith.mulf %0, %0 : vector<1x16x256xf32>
    %cst_6 = arith.constant dense<0.000000e+00> : vector<1x256xf32>
    %7 = vector.multi_reduction <add>, %6, %cst_6 [1] : vector<1x16x256xf32> to vector<1x256xf32>
    %8 = vector.shape_cast %7 : vector<1x256xf32> to vector<1x1x256xf32>
    %cst_7 = arith.constant 1.600000e+01 : f32
    %9 = vector.broadcast %cst_7 : f32 to vector<1x1x256xf32>
    %10 = arith.divf %8, %9 : vector<1x1x256xf32>
    %11 = arith.mulf %5, %5 : vector<1x1x256xf32>
    %12 = arith.subf %10, %11 : vector<1x1x256xf32>
    %cst_8 = arith.constant 9.99999974E-6 : f32
    %13 = vector.broadcast %cst_8 : f32 to vector<1x1x256xf32>
    %14 = arith.addf %12, %13 : vector<1x1x256xf32>
    %15 = math.rsqrt %14 : vector<1x1x256xf32>
    %16 = vector.broadcast %5 : vector<1x1x256xf32> to vector<1x16x256xf32>
    %17 = arith.subf %0, %16 : vector<1x16x256xf32>
    %18 = vector.broadcast %15 : vector<1x1x256xf32> to vector<1x16x256xf32>
    %19 = arith.mulf %17, %18 : vector<1x16x256xf32>
    %20 = vector.broadcast %1 : vector<1x16x1xf32> to vector<1x16x256xf32>
    %21 = arith.mulf %19, %20 : vector<1x16x256xf32>
    %c0_9 = arith.constant 0 : index
    %c0_10 = arith.constant 0 : index
    %c0_11 = arith.constant 0 : index
    %22 = vector.load %arg4[%c0_9, %c0_10, %c0_11] : memref<1x16x1xf32, #tpu.memory_space<vmem>>, vector<1x16x1xf32>
    %23 = vector.broadcast %22 : vector<1x16x1xf32> to vector<1x16x256xf32>
    %24 = arith.addf %21, %23 : vector<1x16x256xf32>
    %c0_12 = arith.constant 0 : index
    %c0_13 = arith.constant 0 : index
    %c0_14 = arith.constant 0 : index
    %25 = vector.load %arg5[%c0_12, %c0_13, %c0_14] : memref<1x16x256xf32, #tpu.memory_space<vmem>>, vector<1x16x256xf32>
    tpu.vector_store %arg5[%c0_12, %c0_13, %c0_14], %24 {strides = array<i32>} : memref<1x16x256xf32, #tpu.memory_space<vmem>>, vector<1x16x256xf32>,
    return
  }
  func.func @transform_0(%arg0: i32, %arg1: i32) -> (i32, i32, i32) {
    %c0_i32 = arith.constant 0 : i32
    %c0_i32_0 = arith.constant 0 : i32
    return %arg0, %c0_i32, %arg1 : i32, i32, i32
  }
  func.func @transform_1(%arg0: i32, %arg1: i32) -> (i32, i32, i32) {
    %c0_i32 = arith.constant 0 : i32
    %c0_i32_0 = arith.constant 0 : i32
    %c0_i32_1 = arith.constant 0 : i32
    %c0_i32_2 = arith.constant 0 : i32
    return %c0_i32, %c0_i32_0, %c0_i32_1 : i32, i32, i32
  }
  func.func @transform_2(%arg0: i32, %arg1: i32) -> (i32, i32, i32) {
    %c0_i32 = arith.constant 0 : i32
    %c0_i32_0 = arith.constant 0 : i32
    %c0_i32_1 = arith.constant 0 : i32
    %c0_i32_2 = arith.constant 0 : i32
    return %c0_i32, %c0_i32_0, %c0_i32_1 : i32, i32, i32
  }
  func.func @transform_3(%arg0: i32, %arg1: i32) -> (i32, i32, i32) {
    %c0_i32 = arith.constant 0 : i32
    %c0_i32_0 = arith.constant 0 : i32
    return %arg0, %c0_i32, %arg1 : i32, i32, i32
  }
}

</mosaic_0001>

<bundles_post_ra>
// kernel: tpu_custom_call.1
= control target key start
LH: loop header
LB: loop body
LE: loop exit
PB: predicated region body
PF: predicated region fallthrough
CT: control target
= control target key end

     0   :  { %8 = vsyncpa [#allocation3], 0  ;;  %s827_s0 = inlined_call_operand.hbm [shape: f32[2,16,256], index: 0, kind: input, shape index: {}]   ;;  %s828_s1 = inlined_call_operand.vmem [shape: f32[1,16,1], index: 1, kind: input, shape index: {}]   ;;  %s829_s2 = inlined_call_operand.vmem [shape: f32[1,16,1], index: 2, kind: input, shape index: {}]   ;;  %s830_s3 = inlined_call_operand.hbm [shape: f32[2,16,256], index: 3, kind: output, shape index: {}]  }
   0x1   :  { %10 = vsyncpa [#allocation3 + $0x1], 0 }
   0x2   :  { %11 = vsyncpa [#allocation4], 0 }
   0x3   :  { %13 = vsyncpa [#allocation4 + $0x1], 0  ;;  %s636_s12 = smov 0   ;;  %s638_s13 = smov 0  }
   0x4   :  { %s640_s14 = smov 0   ;;  %s642_s15 = smov 0  }
   0x5   :  { %s644_s16 = smov 0   ;;  %s646_s17 = smov 0  }
   0x6 LB: > { %s405_s18 = sadd.s32 4294967295, %s607_s17   ;;  %s406_s19 = sadd.s32 4294967294, %s607_s17   ;;  %s607_s17 = sphi %s646_s17, %s19_s17   ;;  %s603_s16 = sphi %s644_s16, %s845_s16   ;;  %s599_s15 = sphi %s642_s15, %s844_s15   ;;  %s595_s14 = sphi %s640_s14, %s843_s14   ;;  %s591_s13 = sphi %s638_s13, %s842_s13   ;;  %s587_s12 = sphi %s636_s12, %s841_s12  }
   0x7   : > { %s31_s20 = sadd.s32 1, %s603_s16  ;;  %s40_s21 = sadd.s32 1, %s595_s14 }
   0x8   : > { %p33_p0 = scmp.ge.s32.totalorder %s31_s20, 2  ;;  %p47_p1 = scmp.ne.s32.totalorder %s595_s14, %s591_s13 }
   0x9   : > { %p48_p2 = scmp.eq.s32.totalorder %s607_s17, 0  ;;  %p53_p3 = scmp.ne.s32.totalorder %s591_s13, %s587_s12 }
   0xa   : > { %s847_s20 = smov (%p33_p0, %s31_s20), 0  ;;  %p54_p5 = scmp.eq.s32.totalorder %s405_s18, 0 }
   0xb   : > { %p677_p4 = por %p48_p2, %p47_p1  ;;  %s35_s23 = ssub.s32 %s603_s16, %s847_s20 }
   0xc   : > { %p121_p6 = scmp.eq.s32.totalorder %s405_s18, 1  ;;  %p38_p7 = scmp.eq.s32.totalorder %s35_s23, 0 }
   0xd   : > { %p683_p8 = por %p54_p5, %p53_p3  ;;  %p127_p10 = scmp.eq.s32.totalorder %s406_s19, 1 }
   0xe   : > { %p687_p9 = por %p121_p6, %p47_p1  ;;  %p434_p13 = scmp.lt.s32.totalorder %s607_s17, 2 }
   0xf   : > { %s692_s26 = scalar_select %p38_p7, %s595_s14, %s40_s21  }
  0x10   : > { %s834_s25 = scalar_select %p687_p9, 1, 0 }
  0x11   : > { %p694_p11 = por %p127_p10, %p53_p3  ;;  %s153_s28 = sand.u32 1, %s595_s14  }
  0x12   : > { %s409_s29 = sshll.u32 %s153_s28, 5  ;;  %s420_s30 = sshll.u32 %s603_s16, 9 }
  0x13   : > { %s835_s27 = scalar_select %p694_p11, 1, 0 }
  0x14   : > { %s705_s6 = scalar_lea.hbm %s827_s0, %s420_s30  ;;  %s157_s7 = scalar_lea.vmem [#allocation2], %s409_s29 }
  0x15   : > { %s166_s8 = sshll.u32 %s157_s7, 4  ;;  %p711_p0 = pnand %p434_p13, %p677_p4  ;;  %s707_s8 = int_to_ptr.vmem [resolvable:$true] %s166_s8 }
  0x16   : > { %s716_s10 = scalar_lea.sflag [#allocation3], %s153_s28  ;;  %s495_s11 = scalar_lea.hbm %s705_s6, 512 }
  0x17   : > { %p496_p2 = scmp.ne.s32.totalorder %s705_s6, %s495_s11  ;;  %p497_p3 = pneg %p711_p0 }
  0x18   : > { %s500_s21 = scalar_lea.hbm %s827_s0, 1024  ;;  %p501_p4 = scmp.lt.u32.totalorder %s705_s6, %s827_s0 }
  0x19   : > { %p498_p5 = pnand %p497_p3, %p496_p2  ;;  %p502_p7 = scmp.lt.u32.totalorder %s500_s21, %s495_s11 }
  0x1a   : > { %p504_p13 = scmp.lt.u32.totalorder %s495_s11, %s705_s6 }
  0x1b   : > { %p499_p6 = pneg %p498_p5  ;;  %p503_p10 = por %p502_p7, %p501_p4 }
  0x1d   : > { %p505_p12 = por %p504_p13, %p503_p10 }
  0x1f   : > { %p506_p1 = pnand %p505_p12, %p499_p6 }
  0x21   : > { %509 = shalt.err (!%p506_p1)
}
  0x22   : > { %s510_s28 = scalar_lea.vmem %s707_s8, 512  ;;  %s609_s29 = smov [#allocation2]  }
  0x23   : > { %p511_p2 = scmp.ne.s32.totalorder %s707_s8, %s510_s28  ;;  %s515_s30 = sshll.u32 %s609_s29, 4  ;;  %s516_s30 = int_to_ptr.vmem [resolvable:$false] %s515_s30 }
  0x24   : > { %s517_s4 = scalar_lea.vmem %s516_s30, 1024  ;;  %p518_p9 = scmp.lt.s32.totalorder %s707_s8, %s516_s30 }
  0x25   : > { %p513_p5 = pnand %p511_p2, %p497_p3  ;;  %p519_p4 = scmp.lt.s32.totalorder %s517_s4, %s510_s28 }
  0x27   : > { %p514_p11 = pneg %p513_p5  ;;  %p520_p7 = por %p519_p4, %p518_p9 }
  0x29   : > { %p521_p10 = pnand %p520_p7, %p514_p11 }
  0x2b   : > { %524 = shalt.err (!%p521_p10)
}
  0x2c   : > { %s610_s5 = smov 256   ;;  %s611_s7 = smov 16  }
  0x2d   : > { %429 = dma.hbm_to_vmem [thread:$0]  (!%p711_p0), %s705_s6, 512, %s707_s8, %s716_s10, %s610_s5, %s610_s5, %s611_s7  }
  0x2e   : > { %p174_p12 = scmp.lt.s32.totalorder %s607_s17, 3  ;;  %p837_p1 = scmp.ge.s32.totalorder %s607_s17, 1 }
  0x30   : > { %p175_p3 = pnand %p837_p1, %p174_p12 }
  0x31   : > { %s748_s11 = sand.u32 (!%p175_p3), 1, %s591_s13  }
  0x32   : > { %178 = sbr.rel (%p175_p3) target bundleno = 211 (0xd3), region = 32  ;;  %s413_s18 = sshll.u32 (!%p175_p3), %s748_s11, 5 }
  0x33   : > { %s181_s19 = scalar_lea.sflag (!%p175_p3), [#allocation3], %s748_s11  ;;  %s184_s21 = scalar_lea.vmem (!%p175_p3), [#allocation2], %s413_s18 }
  0x39   : > { %578 = dma.done.wait (%p683_p8), %s181_s19, 512  }
  0x3a   : > { %580 = vsyncadd (%p683_p8), %s181_s19, 4294966784  ;;  %v612_v0 = vmov 0   ;;  %v282_v1 = vld [vmem:[%s829_s2] sm:$0xff]  ;;  %v283_v3 = vld [vmem:[%s829_s2 + $0x8] sm:$0xff]  ;;  %s206_s29 = scalar_lea.vmem [#allocation5], %s413_s18  ;;  %s421_s4 = sshll.u32 %s599_s15, 9 }
  0x3b   : > { %490 = vset.pattern.permute.xlu1 %v612_v0  ;;  %489 = vset.pattern.permute.xlu0 %v612_v0  ;;  %v213_v2 = vld [vmem:[%s828_s1] sm:$0xff]  ;;  %v214_v4 = vld [vmem:[%s828_s1 + $0x8] sm:$0xff]  ;;  %v211_v6 = vld [vmem:[%s184_s21 + $0x10] sm:$0xff]  ;;  %s318_s30 = sshll.u32 %s206_s29, 4  ;;  %s778_s18 = scalar_lea.hbm %s830_s3, %s421_s4  ;;  %s773_s30 = int_to_ptr.vmem [resolvable:$true] %s318_s30 }
  0x3c   : > { %286 = vperm.xlu1 %490, %v282_v1   ;;  %270 = vperm.xlu0 %489, %v213_v2   ;;  %v209_v5 = vld [vmem:[%s184_s21] sm:$0xff]  ;;  %v210_v7 = vld [vmem:[%s184_s21 + $0x8] sm:$0xff]  ;;  %v212_v8 = vld [vmem:[%s184_s21 + $0x18] sm:$0xff]  ;;  %v234_v11 = vmul.f32 %v211_v6, %v211_v6  ;;  %s303_s15 = scalar_lea.sflag [#allocation4], %s748_s11  ;;  %s525_s19 = scalar_lea.vmem %s773_s30, 512 }
  0x3d   : > { %v215_v9 = vadd.f32 %v211_v6, %v209_v5  ;;  %v232_v10 = vmul.f32 %v209_v5, %v209_v5  ;;  %v222_v12 = vadd.f32 %v212_v8, %v210_v7  ;;  %v233_v13 = vmul.f32 %v210_v7, %v210_v7  ;;  %p526_p8 = scmp.ne.s32.totalorder %s773_s30, %s525_s19  ;;  %p838_p9 = scmp.ne.s32.totalorder %s834_s25, 0 }
  0x3e   : > { %v235_v14 = vmul.f32 %v212_v8, %v212_v8  ;;  %s613_s21 = smov [#allocation5]  }
  0x3f   : > { %v216_v15 = vrot.slane %v215_v9, 4  ;;  %v236_v16 = vadd.f32 %v234_v11, %v232_v10  ;;  %v223_v17 = vrot.slane %v222_v12, 4  ;;  %p527_p11 = pnand %p526_p8, %p838_p9  ;;  %s529_s6 = sshll.u32 %s613_s21, 4  ;;  %s530_s6 = int_to_ptr.vmem [resolvable:$false] %s529_s6 }
  0x40   : > { %291 = vperm.xlu1 %490, %v283_v3   ;;  %275 = vperm.xlu0 %489, %v214_v4   ;;  %v243_v18 = vadd.f32 %v235_v14, %v233_v13  ;;  %s531_s8 = scalar_lea.vmem %s530_s6, 1024  ;;  %p532_p6 = scmp.lt.s32.totalorder %s773_s30, %s530_s6 }
  0x41   : > { %v217_v19 = vadd.f32 %v216_v15, %v215_v9  ;;  %v237_v20 = vrot.slane %v236_v16, 4  ;;  %v224_v21 = vadd.f32 %v223_v17, %v222_v12  ;;  %p528_p0 = pneg %p527_p11  ;;  %p533_p13 = scmp.lt.s32.totalorder %s531_s8, %s525_s19 }
  0x42   : > { %v244_v22 = vrot.slane %v243_v18, 4 }
  0x43   : > { %v218_v23 = vrot.slane %v217_v19, 2  ;;  %v238_v24 = vadd.f32 %v237_v20, %v236_v16  ;;  %v225_v25 = vrot.slane %v224_v21, 2  ;;  %p534_p2 = por %p533_p13, %p532_p6 }
  0x44   : > { %v245_v26 = vadd.f32 %v244_v22, %v243_v18 }
  0x45   : > { %v219_v27 = vadd.f32 %v218_v23, %v217_v19  ;;  %v239_v28 = vrot.slane %v238_v24, 2  ;;  %v226_v29 = vadd.f32 %v225_v25, %v224_v21  ;;  %p535_p5 = pnand %p534_p2, %p528_p0 }
  0x46   : > { %v246_v30 = vrot.slane %v245_v26, 2 }
  0x47   : > { %v220_v31 = vrot.slane %v219_v27, 1  ;;  %v240_v32 = vadd.f32 %v239_v28, %v238_v24  ;;  %v227_v33 = vrot.slane %v226_v29, 1 }
  0x48   : > { %v247_v34 = vadd.f32 %v246_v30, %v245_v26 }
  0x49   : > { %v221_v35 = vadd.f32 %v220_v31, %v219_v27  ;;  %v241_v36 = vrot.slane %v240_v32, 1  ;;  %v228_v37 = vadd.f32 %v227_v33, %v226_v29 }
  0x4a   : > { %v248_v38 = vrot.slane %v247_v34, 1 }
  0x4b   : > { %v230_v39 = vmul.f32 0.0625, %v221_v35  ;;  %v242_v40 = vadd.f32 %v241_v36, %v240_v32  ;;  %v231_v41 = vmul.f32 0.0625, %v228_v37 }
  0x4c   : > { %v249_v42 = vadd.f32 %v248_v38, %v247_v34 }
  0x4d   : > { %v250_v43 = vmul.f32 0.0625, %v242_v40  ;;  %v252_v44 = vmul.f32 %v230_v39, %v230_v39  ;;  %v253_v46 = vmul.f32 %v231_v41, %v231_v41  ;;  %v260_v52 = vsub.f32 %v209_v5, %v230_v39 }
  0x4e   : > { %v251_v45 = vmul.f32 0.0625, %v249_v42  ;;  %v261_v53 = vsub.f32 %v210_v7, %v231_v41  ;;  %v262_v57 = vsub.f32 %v211_v6, %v230_v39  ;;  %v263_v58 = vsub.f32 %v212_v8, %v231_v41 }
  0x4f   : > { %v254_v47 = vsub.f32 %v250_v43, %v252_v44 }
  0x50   : > { %v255_v48 = vsub.f32 %v251_v45, %v253_v46 }
  0x51   : > { %v256_v49 = vadd.f32 1e-05, %v254_v47 }
  0x52   : > { %v257_v50 = vadd.f32 1e-05, %v255_v48 }
  0x53   : > { %491 = vrsqrt.f32 %v256_v49 }
  0x54   : > { %493 = vrsqrt.f32 %v257_v50 }
  0x5d   : > { %v492_v51 = vpop.eup %491 }
  0x5e   : > { %v494_v54 = vpop.eup %493  ;;  %v264_v55 = vmul.f32 %v492_v51, %v260_v52  ;;  %v266_v63 = vmul.f32 %v492_v51, %v262_v57 }
  0x5f   : > { %v265_v56 = vmul.f32 %v494_v54, %v261_v53  ;;  %v267_v0 = vmul.f32 %v494_v54, %v263_v58 }
  0xbb   : > { %v287_v59 = vpop.permute.xlu1 %286  ;;  %v271_v60 = vpop.permute.xlu0 %270 }
  0xbc   : > { %v278_v61 = vmul.f32 %v271_v60, %v264_v55  ;;  %v279_v62 = vmul.f32 %v271_v60, %v265_v56 }
  0xbe   : > { %v294_v1 = vadd.f32 %v287_v59, %v278_v61  ;;  %v295_v2 = vadd.f32 %v287_v59, %v279_v62 }
  0xbf   : > { %v276_v3 = vpop.permute.xlu0 %275  ;;  %v292_v6 = vpop.permute.xlu1 %291 }
  0xc0   : > { %298 = vst [vmem:[%s206_s29] sm:$0xff] %v294_v1  ;;  %299 = vst [vmem:[%s206_s29 + $0x8] sm:$0xff] %v295_v2  ;;  %v280_v4 = vmul.f32 %v276_v3, %v266_v63  ;;  %v281_v5 = vmul.f32 %v276_v3, %v267_v0 }
  0xc2   : > { %v296_v7 = vadd.f32 %v292_v6, %v280_v4  ;;  %v297_v8 = vadd.f32 %v292_v6, %v281_v5 }
  0xc4   : > { %300 = vst [vmem:[%s206_s29 + $0x10] sm:$0xff] %v296_v7  ;;  %301 = vst [vmem:[%s206_s29 + $0x18] sm:$0xff] %v297_v8 }
  0xc5   : > { %538 = shalt.err (!%p535_p5)
}
  0xc6   : > { %s539_s9 = scalar_lea.hbm %s778_s18, 512  ;;  %s543_s23 = scalar_lea.hbm %s830_s3, 1024 }
  0xc7   : > { %p540_p4 = scmp.ne.s32.totalorder %s778_s18, %s539_s9  ;;  %p544_p12 = scmp.lt.u32.totalorder %s778_s18, %s830_s3 }
  0xc8   : > { %p545_p1 = scmp.lt.u32.totalorder %s543_s23, %s539_s9  ;;  %p547_p8 = scmp.lt.u32.totalorder %s539_s9, %s778_s18 }
  0xc9   : > { %p541_p7 = pnand %p540_p4, %p838_p9 }
  0xca   : > { %p546_p3 = por %p545_p1, %p544_p12 }
  0xcb   : > { %p542_p10 = pneg %p541_p7 }
  0xcc   : > { %p548_p11 = por %p547_p8, %p546_p3 }
  0xce   : > { %p549_p0 = pnand %p548_p11, %p542_p10 }
  0xd0   : > { %552 = shalt.err (!%p549_p0)
}
  0xd1   : > { %s614_s29 = smov 256   ;;  %s615_s4 = smov 16  }
  0xd2   : > { %424 = dma.vmem_to_hbm [thread:$0]  (%p838_p9), %s773_s30, 512, %s778_s18, %s303_s15, %s614_s29, %s614_s29, %s615_s4  }
  0xd3 PF: > { %s333_s5 = sand.u32 1, %s587_s12   ;;  %p839_p6 = scmp.ne.s32.totalorder %s835_s27, 0 }
  0xd4   : > { %p840_p13 = scmp.ge.s32.totalorder %s607_s17, 2  ;;  %s334_s7 = scalar_lea.sflag [#allocation4], %s333_s5 }
  0xd6   : > { %p431_p2 = pnand %p840_p13, %p839_p6 }
  0xd8   : > { %582 = dma.done.wait (!%p431_p2), %s334_s7, 512  }
  0xd9   : > { %584 = vsyncadd (!%p431_p2), %s334_s7, 4294966784  ;;  %s19_s17 = sadd.s32 1, %s607_s17   ;;  %s841_s12 = smov %s591_s13 }
  0xda   : > { %p16_p5 = scmp.ge.s32.totalorder %s19_s17, 4   ;;  %s842_s13 = smov %s595_s14 }
  0xdb   : > { %s843_s14 = smov %s692_s26  ;;  %s844_s15 = smov %s603_s16 }
  0xdc   : > { %s845_s16 = smov %s847_s20  ;;  %18 = sbr.rel (!%p16_p5) target bundleno = 6 (0x6), region = 77 }
  0xe3   :  { %339 = vsyncpa [#allocation3], 1 }
  0xe4   :  { %341 = vsyncpa [#allocation3 + $0x1], 1 }
  0xe5   :  { %342 = vsyncpa [#allocation4], 1 }
  0xe6   :  { %344 = vsyncpa [#allocation4 + $0x1], 1 }

</bundles_post_ra>
